<compile_context>
chip_gen: v5e
topology: v5e:2x2
jax: 0.10.0
libtpu: 0.0.40
codegen_flags: <defaults>
</compile_context>

<pallas_src>
import jax
import jax.numpy as jnp
from jax.experimental import pallas as pl
from jax.experimental.pallas import tpu as pltpu


def _round_up(x, k):
    return (x + k - 1) // k * k


def _cdiv(a, b):
    return -(-a // b)


def _choose_batch_tile(batch, target):
    """Multiple-of-8 batch tile: >= 2 tiles when possible (v7x megacore) and
    minimal padding waste for awkward batch sizes."""
    b8 = _round_up(batch, 8)
    if b8 <= 8:
        return 8
    n_tiles = max(2, _cdiv(b8, target))
    return min(_round_up(_cdiv(b8, n_tiles), 8), target)


def lista_kernel(thr_ref, y_ref, wt_ref, st_ref, out_ref, wy_ref, d_ref):
    """Grid = (batch_tiles, numIter); iteration axis innermost / "arbitrary".

    thr_ref : (numIter,)    f32 SMEM  per-iteration threshold
    y_ref   : (TB, n)       VMEM      batch tile of measurements (MXU dtype)
    wt_ref  : (n, Mp)       VMEM      W^T, lane-padded to Mp = ceil(m/128)*128
    st_ref  : (Mp, Mp)      VMEM      S^T, lane-padded
    out_ref : (1, TB, Mp)   f32 VMEM  this iteration's code for this batch tile
    wy_ref  : (TB, Mp)      f32 VMEM  scratch: y @ W^T (iteration invariant)
    d_ref   : (TB, Mp)      f32 VMEM  scratch: carried code d_k
    """
    it = pl.program_id(1)

    @pl.when(it == 0)
    def _():
        # y @ W^T is iteration-invariant: compute once per batch tile, reuse.
        wy_ref[...] = jnp.dot(y_ref[...], wt_ref[...],
                              preferred_element_type=jnp.float32)
        d_ref[...] = jnp.zeros_like(d_ref)

    z = wy_ref[...] + jnp.dot(d_ref[...].astype(st_ref.dtype), st_ref[...],
                              preferred_element_type=jnp.float32)
    theta = thr_ref[it]
    # soft_thr(z, θ) = relu(z-θ) - relu(-z-θ) == max(z-θ, 0) + min(z+θ, 0)
    # (identical for every sign of θ; one fewer VPU op than the two-ReLU form)
    d_new = jnp.maximum(z - theta, 0.0) + jnp.minimum(z + theta, 0.0)
    d_ref[...] = d_new
    out_ref[0] = d_new.astype(out_ref.dtype)


def prepare_lista_params(W, S, thr, *, mxu_dtype=jnp.bfloat16):
    """One-time parameter preprocessing (hoisted out of the forward call):
    transpose, zero-pad the code dimension m to a multiple of 128 (lane-dense)
    and cast the MXU operands.  Zero padding is exact through the soft
    threshold (padded columns stay identically zero)."""
    m, n = W.shape
    m_pad = _round_up(m, 128)
    wt = jnp.pad(jnp.asarray(W, jnp.float32).T,
                 ((0, 0), (0, m_pad - m))).astype(mxu_dtype)           # (n, Mp) = W^T
    st = jnp.pad(jnp.asarray(S, jnp.float32).T,
                 ((0, m_pad - m), (0, m_pad - m))).astype(mxu_dtype)   # (Mp, Mp) = S^T
    thr_flat = jnp.asarray(thr, jnp.float32).reshape(-1)
    return {"wt": wt, "st": st, "thr": thr_flat, "m": m, "n": n, "m_pad": m_pad}


def lista_apply(params, y, *, batch_tile=256):
    """y: (B, n) -> (numIter, B, m) stacked codes (float32)."""
    wt, st, thr = params["wt"], params["st"], params["thr"]
    m, n, m_pad = params["m"], params["n"], params["m_pad"]
    num_iter = thr.shape[0]
    B = y.shape[0]

    tb = _choose_batch_tile(B, batch_tile)
    b_pad = _round_up(_round_up(B, 8), tb)
    y_p = jnp.pad(jnp.asarray(y, jnp.float32),
                  ((0, b_pad - B), (0, 0))).astype(wt.dtype)

    # VMEM budget: y double-buffer + single-buffered W^T/S^T + double-buffered
    # per-iteration output tile + wy/d scratch, with headroom; capped at 64 MiB
    # so the same setting is valid on v7x.
    isz = jnp.dtype(wt.dtype).itemsize
    vmem_bytes = (2 * tb * n * isz + n * m_pad * isz + m_pad * m_pad * isz
                  + 2 * tb * m_pad * 4 + 2 * tb * m_pad * 4)
    vmem_limit = int(min(64 * 2**20, max(32 * 2**20, 2 * vmem_bytes + (4 << 20))))

    grid_spec = pltpu.PrefetchScalarGridSpec(
        num_scalar_prefetch=0,
        grid=(b_pad // tb, num_iter),
        in_specs=[
            pl.BlockSpec(memory_space=pltpu.MemorySpace.SMEM),         # thr
            pl.BlockSpec((tb, n), lambda b, it: (b, 0)),               # y batch tile
            pl.BlockSpec((n, m_pad), lambda b, it: (0, 0),             # W^T (grid invariant)
                         pipeline_mode=pl.Buffered(1)),
            pl.BlockSpec((m_pad, m_pad), lambda b, it: (0, 0),         # S^T (grid invariant)
                         pipeline_mode=pl.Buffered(1)),
        ],
        out_specs=pl.BlockSpec((1, tb, m_pad), lambda b, it: (it, b, 0)),
        scratch_shapes=[
            pltpu.VMEM((tb, m_pad), jnp.float32),   # wy = y @ W^T
            pltpu.VMEM((tb, m_pad), jnp.float32),   # carried code d
        ],
    )

    out = pl.pallas_call(
        lista_kernel,
        out_shape=jax.ShapeDtypeStruct((num_iter, b_pad, m_pad), jnp.float32),
        grid_spec=grid_spec,
        compiler_params=pltpu.CompilerParams(
            # batch tiles are independent -> parallel (2 TCs on v7x);
            # LISTA iterations carry d/wy in scratch -> arbitrary.
            dimension_semantics=("parallel", "arbitrary"),
            vmem_limit_bytes=vmem_limit),
    )(thr, y_p, wt, st)

    return out[:, :B, :m]


def lista_forward(y, W, S, thr, *, mxu_dtype=jnp.bfloat16, batch_tile=256):
    """Convenience one-shot wrapper: y (B, n); W (m, n); S (m, m); thr (numIter, 1)."""
    return lista_apply(prepare_lista_params(W, S, thr, mxu_dtype=mxu_dtype), y,
                       batch_tile=batch_tile)


def lista_ref(y, W, S, thr):
    """Pure-JAX reference matching the PyTorch forward (true-f32 matmuls,
    as PyTorch does on CPU/GPU)."""
    num_iter = thr.shape[0]
    d = jnp.zeros((y.shape[0], W.shape[0]), jnp.float32)
    wy = jnp.dot(y, W.T, precision=jax.lax.Precision.HIGHEST)
    outs = []
    for i in range(num_iter):
        z = wy + jnp.dot(d, S.T, precision=jax.lax.Precision.HIGHEST)
        t = thr[i, 0]
        d = jnp.maximum(z - t, 0.0) - jnp.maximum(-z - t, 0.0)
        outs.append(d)
    return jnp.stack(outs)


if __name__ == "__main__":
    key = jax.random.PRNGKey(0)
    k_dict, k_y = jax.random.split(key)

    # Dictionary A is (n, m): LISTA(m=A.shape[1], n=A.shape[0], ...)
    n, m = 16, 32
    B = 8
    num_iter = 5

    A = jax.random.normal(k_dict, (n, m), dtype=jnp.float32)
    y = jax.random.normal(k_y, (B, n), dtype=jnp.float32)

    # ISTA-stable step size: alpha >= ||A||_2^2 (Frobenius^2 upper bound),
    # as in standard LISTA initialisation.
    alpha = float(jnp.sum(A * A))

    # Deterministic parameter init == LISTA.weights_init():
    #   S = I - (1/alpha) A^T A ; W = (1/alpha) A^T ; thr = 0.1/alpha
    S = jnp.eye(m, dtype=jnp.float32) - (1.0 / alpha) * (A.T @ A)   # (m, m)
    W = (1.0 / alpha) * A.T                                          # (m, n)
    thr = jnp.ones((num_iter, 1), jnp.float32) * (0.1 / alpha)

    ref = lista_ref(y, W, S, thr)
    scale = float(jnp.max(jnp.abs(ref)))

    # Default fast path: bf16 MXU operands, f32 accumulation / carry / output.
    params = prepare_lista_params(W, S, thr, mxu_dtype=jnp.bfloat16)
    out = jax.block_until_ready(lista_apply(params, y))
    assert out.shape == (num_iter, B, m)
    err = float(jnp.max(jnp.abs(out - ref)))
    if err > 0.08 * scale + 1e-5:
        raise AssertionError(f"bf16-MXU Pallas LISTA deviates from reference: {err}")

    # Exact path: f32 MXU operands (matches the PyTorch/JAX reference tightly).
    params_f32 = prepare_lista_params(W, S, thr, mxu_dtype=jnp.float32)
    out_f32 = jax.block_until_ready(lista_apply(params_f32, y))
    if not jnp.allclose(out_f32, ref, atol=1e-4, rtol=1e-4):
        raise AssertionError("f32 Pallas LISTA does not match JAX reference")

    print("KERNEL_OK")
</pallas_src>

<mosaic_0001>
module attributes {stable_mosaic.version = 11 : i64} {
  func.func @lista_kernel(%arg0: i32, %arg1: i32, %arg2: memref<5xf32, #tpu.memory_space<smem>>, %arg3: memref<8x16xbf16, #tpu.memory_space<vmem>>, %arg4: memref<16x128xbf16, #tpu.memory_space<vmem>>, %arg5: memref<128x128xbf16, #tpu.memory_space<vmem>>, %arg6: memref<1x8x128xf32, #tpu.memory_space<vmem>>, %arg7: memref<8x128xf32, #tpu.memory_space<vmem>>, %arg8: memref<8x128xf32, #tpu.memory_space<vmem>>) attributes {dimension_semantics = [#tpu.dimension_semantics<parallel>, #tpu.dimension_semantics<arbitrary>], iteration_bounds = array<i64: 1, 5>, scalar_prefetch = 0 : i64, scratch_operands = 2 : i64, tpu.core_type = #tpu.core_type<tc>, window_params = [{transform_indices = @transform_0, window_bounds = array<i64: 5>}, {transform_indices = @transform_1, window_bounds = array<i64: 8, 16>}, {pipeline_mode = #tpu.pipeline_mode<synchronous>, transform_indices = @transform_2, window_bounds = array<i64: 16, 128>}, {pipeline_mode = #tpu.pipeline_mode<synchronous>, transform_indices = @transform_3, window_bounds = array<i64: 128, 128>}, {transform_indices = @transform_4, window_bounds = array<i64: 1, 8, 128>}]} {
    %c0_i32 = arith.constant 0 : i32
    %0 = arith.cmpi eq, %arg1, %c0_i32 : i32
    %1 = arith.extui %0 : i1 to i32
    %c0_i32_0 = arith.constant 0 : i32
    %2 = arith.cmpi ne, %1, %c0_i32_0 : i32
    scf.if %2 {
      %c0_13 = arith.constant 0 : index
      %c0_14 = arith.constant 0 : index
      %24 = vector.load %arg3[%c0_13, %c0_14] : memref<8x16xbf16, #tpu.memory_space<vmem>>, vector<8x16xbf16>
      %c0_15 = arith.constant 0 : index
      %c0_16 = arith.constant 0 : index
      %25 = vector.load %arg4[%c0_15, %c0_16] : memref<16x128xbf16, #tpu.memory_space<vmem>>, vector<16x128xbf16>
      %cst_17 = arith.constant dense<0.000000e+00> : vector<8x128xf32>
      %26 = tpu.matmul %24, %25, %cst_17 {dimension_numbers = #tpu.dot_dimension_numbers<[1], [0], [0], [1], [0, 0, 1, 1], [], []>} : vector<8x16xbf16>, vector<16x128xbf16>, vector<8x128xf32> -> vector<8x128xf32>
      %c0_18 = arith.constant 0 : index
      %c0_19 = arith.constant 0 : index
      %27 = vector.load %arg7[%c0_18, %c0_19] : memref<8x128xf32, #tpu.memory_space<vmem>>, vector<8x128xf32>
      tpu.vector_store %arg7[%c0_18, %c0_19], %26 {strides = array<i32>} : memref<8x128xf32, #tpu.memory_space<vmem>>, vector<8x128xf32>,
      %cst_20 = arith.constant 0.000000e+00 : f32
      %28 = vector.broadcast %cst_20 : f32 to vector<8x128xf32>
      %c0_21 = arith.constant 0 : index
      %c0_22 = arith.constant 0 : index
      %29 = vector.load %arg8[%c0_21, %c0_22] : memref<8x128xf32, #tpu.memory_space<vmem>>, vector<8x128xf32>
      tpu.vector_store %arg8[%c0_21, %c0_22], %28 {strides = array<i32>} : memref<8x128xf32, #tpu.memory_space<vmem>>, vector<8x128xf32>,
    } else {
    }
    %c0 = arith.constant 0 : index
    %c0_1 = arith.constant 0 : index
    %3 = vector.load %arg7[%c0, %c0_1] : memref<8x128xf32, #tpu.memory_space<vmem>>, vector<8x128xf32>
    %c0_2 = arith.constant 0 : index
    %c0_3 = arith.constant 0 : index
    %4 = vector.load %arg8[%c0_2, %c0_3] : memref<8x128xf32, #tpu.memory_space<vmem>>, vector<8x128xf32>
    %5 = arith.truncf %4 : vector<8x128xf32> to vector<8x128xbf16>
    %c0_4 = arith.constant 0 : index
    %c0_5 = arith.constant 0 : index
    %6 = vector.load %arg5[%c0_4, %c0_5] : memref<128x128xbf16, #tpu.memory_space<vmem>>, vector<128x128xbf16>
    %cst = arith.constant dense<0.000000e+00> : vector<8x128xf32>
    %7 = tpu.matmul %5, %6, %cst {dimension_numbers = #tpu.dot_dimension_numbers<[1], [0], [0], [1], [0, 0, 1, 1], [], []>} : vector<8x128xbf16>, vector<128x128xbf16>, vector<8x128xf32> -> vector<8x128xf32>
    %8 = arith.addf %3, %7 : vector<8x128xf32>
    %9 = arith.index_cast %arg1 : i32 to index
    %10 = memref.load %arg2[%9] : memref<5xf32, #tpu.memory_space<smem>>
    %11 = vector.broadcast %10 : f32 to vector<8x128xf32>
    %12 = arith.subf %8, %11 : vector<8x128xf32>
    %cst_6 = arith.constant 0.000000e+00 : f32
    %13 = vector.broadcast %cst_6 : f32 to vector<8x128xf32>
    %14 = arith.maximumf %12, %13 : vector<8x128xf32>
    %15 = vector.broadcast %10 : f32 to vector<8x128xf32>
    %16 = arith.addf %8, %15 : vector<8x128xf32>
    %cst_7 = arith.constant 0.000000e+00 : f32
    %17 = vector.broadcast %cst_7 : f32 to vector<8x128xf32>
    %18 = arith.minimumf %16, %17 : vector<8x128xf32>
    %19 = arith.addf %14, %18 : vector<8x128xf32>
    %c0_8 = arith.constant 0 : index
    %c0_9 = arith.constant 0 : index
    %20 = vector.load %arg8[%c0_8, %c0_9] : memref<8x128xf32, #tpu.memory_space<vmem>>, vector<8x128xf32>
    tpu.vector_store %arg8[%c0_8, %c0_9], %19 {strides = array<i32>} : memref<8x128xf32, #tpu.memory_space<vmem>>, vector<8x128xf32>,
    %c0_10 = arith.constant 0 : index
    %c0_11 = arith.constant 0 : index
    %c0_12 = arith.constant 0 : index
    %21 = vector.load %arg6[%c0_10, %c0_11, %c0_12] : memref<1x8x128xf32, #tpu.memory_space<vmem>>, vector<1x8x128xf32>
    %22 = vector.shape_cast %21 : vector<1x8x128xf32> to vector<8x128xf32>
    %23 = vector.shape_cast %19 : vector<8x128xf32> to vector<1x8x128xf32>
    tpu.vector_store %arg6[%c0_10, %c0_11, %c0_12], %23 {strides = array<i32>} : memref<1x8x128xf32, #tpu.memory_space<vmem>>, vector<1x8x128xf32>,
    return
  }
  func.func @transform_0(%arg0: i32, %arg1: i32) -> i32 {
    %c0_i32 = arith.constant 0 : i32
    %c0_i32_0 = arith.constant 0 : i32
    return %c0_i32 : i32
  }
  func.func @transform_1(%arg0: i32, %arg1: i32) -> (i32, i32) {
    %c0_i32 = arith.constant 0 : i32
    %c0_i32_0 = arith.constant 0 : i32
    return %arg0, %c0_i32 : i32, i32
  }
  func.func @transform_2(%arg0: i32, %arg1: i32) -> (i32, i32) {
    %c0_i32 = arith.constant 0 : i32
    %c0_i32_0 = arith.constant 0 : i32
    %c0_i32_1 = arith.constant 0 : i32
    return %c0_i32, %c0_i32_0 : i32, i32
  }
  func.func @transform_3(%arg0: i32, %arg1: i32) -> (i32, i32) {
    %c0_i32 = arith.constant 0 : i32
    %c0_i32_0 = arith.constant 0 : i32
    %c0_i32_1 = arith.constant 0 : i32
    return %c0_i32, %c0_i32_0 : i32, i32
  }
  func.func @transform_4(%arg0: i32, %arg1: i32) -> (i32, i32, i32) {
    %c0_i32 = arith.constant 0 : i32
    %c0_i32_0 = arith.constant 0 : i32
    return %arg1, %arg0, %c0_i32 : i32, i32, i32
  }
}

</mosaic_0001>

<bundles_post_ra>
// kernel: tpu_custom_call.1
= control target key start
LH: loop header
LB: loop body
LE: loop exit
PB: predicated region body
PF: predicated region fallthrough
CT: control target
= control target key end

     0   :  { %s1047_s0 = inlined_call_operand.hbm [shape: f32[5], index: 0, kind: input, shape index: {}]   ;;  %s1048_s1 = inlined_call_operand.hbm [shape: bf16[8,16], index: 1, kind: input, shape index: {}]   ;;  %s1049_s2 = inlined_call_operand.hbm [shape: bf16[16,128], index: 2, kind: input, shape index: {}]   ;;  %s1050_s3 = inlined_call_operand.hbm [shape: bf16[128,128], index: 3, kind: input, shape index: {}]   ;;  %s1051_s4 = inlined_call_operand.hbm [shape: f32[5,8,128], index: 4, kind: output, shape index: {}]  }
   0x1   :  { %1053 = sst [smem:[#allocation18_spill]] %s1049_s2 }
   0x2   :  { %9 = vsyncpa [#allocation7], 0 }
   0x3   :  { %10 = vsyncpa [#allocation5], 0 }
   0x4   :  { %11 = vsyncpa [#allocation10], 0 }
   0x5   :  { %12 = vsyncpa [#allocation6], 0 }
   0x6   :  { %14 = vsyncpa [#allocation6 + $0x1], 0  ;;  %s892_s15 = smov 0   ;;  %s894_s16 = smov 0  }
   0x7   :  { %s896_s17 = smov 0   ;;  %s898_s18 = smov 0  }
   0x8   :  { %s900_s19 = smov 0   ;;  %s902_s20 = smov 0  }
   0x9 LB: > { %s500_s21 = sadd.s32 4294967295, %s858_s20   ;;  %s501_s22 = sadd.s32 4294967294, %s858_s20   ;;  %s858_s20 = sphi %s902_s20, %s20_s20   ;;  %s854_s19 = sphi %s900_s19, %s1066_s19   ;;  %s850_s18 = sphi %s898_s18, %s1065_s18   ;;  %s846_s17 = sphi %s896_s17, %s1064_s17   ;;  %s842_s16 = sphi %s894_s16, %s1063_s16   ;;  %s838_s15 = sphi %s892_s15, %s1062_s15  }
   0xa   : > { %s29_s23 = sadd.s32 1, %s854_s19  ;;  %s130_s24 = sadd.s32 1, %s846_s17 }
   0xb   : > { %p30_p0 = scmp.ge.s32.totalorder %s29_s23, 5  ;;  %p140_p1 = scmp.ne.s32.totalorder %s846_s17, %s842_s16 }
   0xc   : > { %p141_p2 = scmp.eq.s32.totalorder %s500_s21, 4  ;;  %p146_p3 = scmp.ne.s32.totalorder %s842_s16, %s838_s15 }
   0xd   : > { %s1068_s23 = smov (%p30_p0, %s29_s23), 0  ;;  %p147_p5 = scmp.eq.s32.totalorder %s501_s22, 4 }
   0xe   : > { %1054 = sst [smem:[#allocation17_spill]] %s1068_s23  ;;  %p932_p4 = por %p141_p2, %p140_p1 }
   0xf   : > { %s125_s26 = ssub.s32 %s854_s19, %s1068_s23  ;;  %p502_p6 = scmp.ge.s32.totalorder %s858_s20, 1 }
  0x10   : > { %p128_p7 = scmp.eq.s32.totalorder %s125_s26, 0  ;;  %p939_p8 = por %p147_p5, %p146_p3 }
  0x11   : > { %p154_p9 = scmp.lt.s32.totalorder %s858_s20, 6  ;;  %p951_p11 = scmp.eq.s32.totalorder %s500_s21, 0 }
  0x12   : > { %s945_s28 = scalar_select %p128_p7, %s846_s17, %s130_s24  }
  0x13   : > { %p947_p10 = pnand %p502_p6, %p154_p9  ;;  %s1059_s2 = sld [smem:[#allocation18_spill]] }
  0x14   : > { %s860_s8 = smov [#allocation9]   ;;  %s861_s11 = smov 64  }
  0x15   : > { %p582_p12 = pneg %p947_p10  ;;  %s191_s9 = sshll.u32 %s860_s8, 4  ;;  %s192_s9 = int_to_ptr.vmem [resolvable:$true] %s191_s9 }
  0x16   : > { %s862_s12 = smov 4   ;;  %s166_s21 = sshll.u32 %s1047_s0, 4  ;;  %s167_s21 = int_to_ptr.hbm [resolvable:$true] %s166_s21 }
  0x17   : > { %p962_p13 = pnand %p951_p11, %p582_p12  ;;  %s178_s26 = sshll.u32 %s1048_s1, 4  ;;  %s179_s26 = int_to_ptr.hbm [resolvable:$true] %s178_s26 }
  0x18   : > { %s863_s5 = smov [#allocation4]   ;;  %s864_s6 = smov [#allocation8]  }
  0x19   : > { %s189_s7 = sshll.u32 %s1059_s2, 4  ;;  %s180_s8 = sshll.u32 %s864_s6, 4  ;;  %s190_s7 = int_to_ptr.hbm [resolvable:$true] %s189_s7  ;;  %s181_s8 = int_to_ptr.vmem [resolvable:$true] %s180_s8 }
  0x1a   : > { %591 = dma.hbm_to_vmem [thread:$0]  (!%p962_p13), %s190_s7, 128, %s192_s9, [#allocation10], %s861_s11, %s861_s11, %s862_s12  }
  0x1b   : > { %585 = dma.hbm_to_smem (!%p962_p13), %s167_s21, 16, %s863_s5, [#allocation7]  }
  0x1c   : > { %s203_s7 = sshll.u32 %s1050_s3, 4  ;;  %s865_s9 = smov [#allocation11]   ;;  %s204_s7 = int_to_ptr.hbm [resolvable:$true] %s203_s7 }
  0x1d   : > { %588 = dma.hbm_to_vmem [thread:$0]  (!%p962_p13), %s179_s26, 64, %s181_s8, [#allocation5]  }
  0x1e   : > { %s205_s13 = sshll.u32 %s865_s9, 4  ;;  %221 = sbr.rel (%p947_p10) target bundleno = 357 (0x165), region = 36  ;;  %s206_s13 = int_to_ptr.vmem [resolvable:$true] %s205_s13 }
  0x1f   : > { %594 = dma.hbm_to_vmem [thread:$0]  (!%p962_p13), %s204_s7, 1024, %s206_s13, [#allocation10], %s861_s11, %s861_s11, %s862_s12  }
  0x23   : > { %821 = dma.done.wait (%p951_p11), [#allocation7], 16  }
  0x24   : > { %823 = vsyncadd (%p951_p11), [#allocation7], 4294967280 }
  0x25   : > { %825 = dma.done.wait (%p951_p11), [#allocation5], 64  }
  0x26   : > { %827 = vsyncadd (%p951_p11), [#allocation5], 4294967232 }
  0x27   : > { %829 = dma.done.wait (%p951_p11), [#allocation10], 1152  }
  0x28   : > { %831 = vsyncadd (%p951_p11), [#allocation10], 4294966144 }
  0x29   : > { %243 = sfence }
  0x2a   : > { %s256_s2 = sand.u32 1, %s842_s16   ;;  %p513_p0 = scmp.ne.s32.totalorder %s850_s18, 0 }
  0x2b   : > { %s1000_s23 = sshll.u32 %s256_s2, 3 }
  0x2c   : > { %s258_s29 = scalar_lea.vmem [#allocation12], %s1000_s23  ;;  %263 = sbr.rel (%p513_p0) target bundleno = 187 (0xbb), region = 56 }
  0x31   : > { %v555_v0 = vld [vmem:[#allocation9] sm:$0xff]  ;;  %v264_v1 = vld [vmem:[#allocation8] sm:$0xf]  ;;  %vm273_vm0 = vcmask 130048   ;;  %v866_v2 = vmov 0.0  }
  0x32   : > { %284 = vmatpush.bf16.msra.mxu0 %v555_v0  ;;  %291 = vst [vmem:[#allocation3] sm:$0xff] %v866_v2 }
  0x35   : > { %518 = vmatmul.msk.bf16.vlgmr.msra.gmra.mxu0 %vm273_vm0, %v264_v1 }
  0xb2   : > { %v286_v3 = vpop.f32.mrf.mxu0 }
  0xb3   : > { %290 = vst [vmem:[#allocation2] sm:$0xff] %v286_v3 }
  0xba   : > { %v288_v4 = vpop.f32.mrf.mxu0 }
  0xbb PF: > { %v563_v5 = vld [vmem:[#allocation11 + $0x38] sm:$0xff]  ;;  %v562_v6 = vld [vmem:[#allocation11 + $0x30] sm:$0xff]  ;;  %v561_v7 = vld [vmem:[#allocation11 + $0x28] sm:$0xff]  ;;  %s373_s30 = sld [smem:[#allocation4 + %s850_s18]]  ;;  %s552_s10 = sshll.u32 %s850_s18, 3 }
  0xbc   : > { %359 = vmatpush.bf16.msra.mxu0 %v563_v5  ;;  %v560_v8 = vld [vmem:[#allocation11 + $0x20] sm:$0xff]  ;;  %v559_v9 = vld [vmem:[#allocation11 + $0x18] sm:$0xff]  ;;  %v558_v10 = vld [vmem:[#allocation11 + $0x10] sm:$0xff]  ;;  %s394_s14 = scalar_lea.hbm %s1051_s4, %s552_s10  ;;  %s396_s21 = sshll.u32 %s258_s29, 4  ;;  %s397_s21 = int_to_ptr.vmem [resolvable:$true] %s396_s21 }
  0xbd   : > { %v557_v11 = vld [vmem:[#allocation11 + $0x8] sm:$0xff]  ;;  %v556_v12 = vld [vmem:[#allocation11] sm:$0xff]  ;;  %s398_s22 = sshll.u32 %s394_s14, 4  ;;  %s383_s18 = scalar_lea.sflag [#allocation6], %s256_s2  ;;  %s399_s22 = int_to_ptr.hbm [resolvable:$true] %s398_s22 }
  0xbe   : > { %v293_v13 = vld [vmem:[#allocation3] sm:$0xff]  ;;  %v292_v15 = vld [vmem:[#allocation2] sm:$0xff]  ;;  %s782_s24 = sshra.s32 %s399_s22, 4  ;;  %s788_s8 = scalar_lea.hbm %s1051_s4, 40  ;;  %s783_s24 = int_to_ptr.hbm [resolvable:$true] %s782_s24 }
  0xbf   : > { %v294_v14 = vpack.c.bf16 %v293_v13, %v293_v13  ;;  %s784_s26 = scalar_lea.hbm %s783_s24, 8  ;;  %p789_p5 = scmp.lt.s32.totalorder %s783_s24, %s1051_s4 }
  0xc0   : > { %360 = vmatpush.bf16.msra.mxu0 %v562_v6  ;;  %p785_p1 = scmp.ne.s32.totalorder %s783_s24, %s784_s26  ;;  %p790_p6 = scmp.lt.s32.totalorder %s788_s8, %s784_s26 }
  0xc1   : > { %v374_v17 = vstv %s373_s30 }
  0xc2   : > { %p786_p2 = pnand %p785_p1, %p932_p4  ;;  %p791_p7 = por %p790_p6, %p789_p5 }
  0xc4   : > { %361 = vmatpush.bf16.msra.mxu0 %v561_v7  ;;  %p787_p3 = pneg %p786_p2 }
  0xc6   : > { %p792_p9 = pnand %p791_p7, %p787_p3 }
  0xc8   : > { %362 = vmatpush.bf16.msra.mxu0 %v560_v8 }
  0xcc   : > { %363 = vmatpush.bf16.msra.mxu0 %v559_v9 }
  0xd0   : > { %364 = vmatpush.bf16.msra.mxu0 %v558_v10 }
  0xd4   : > { %365 = vmatpush.bf16.msra.mxu0 %v557_v11 }
  0xd8   : > { %366 = vmatpush.bf16.msra.mxu0 %v556_v12 }
  0xdb   : > { %367 = vmatmul.bf16.vlgmr.msra.gmra.mxu0 %v294_v14 }
 0x158   : > { %v368_v16 = vpop.f32.mrf.mxu0 }
 0x159   : > { %v372_v18 = vadd.f32 %v368_v16, %v292_v15 }
 0x15b   : > { %v375_v19 = vsub.f32 %v372_v18, %v374_v17  ;;  %v377_v20 = vadd.f32 %v374_v17, %v372_v18 }
 0x15d   : > { %v376_v21 = vmax.f32 %v375_v19, 0.0  ;;  %v378_v22 = vmin.f32 %v377_v20, 0.0 }
 0x15f   : > { %v379_v23 = vadd.f32 %v378_v22, %v376_v21 }
 0x160   : > { %v370_v24 = vpop.f32.mrf.mxu0 }
 0x161   : > { %380 = vst [vmem:[#allocation3] sm:$0xff] %v379_v23 }
 0x162   : > { %381 = vst [vmem:[%s258_s29] sm:$0xff] %v379_v23 }
 0x163   : > { %795 = shalt.err (!%p792_p9)
}
 0x164   : > { %580 = dma.vmem_to_hbm [thread:$0]  (%p932_p4), %s397_s21, 128, %s399_s22, %s383_s18  }
 0x165 PF: > { %p607_p10 = scmp.ge.s32.totalorder %s858_s20, 2  ;;  %s410_s13 = sand.u32 1, %s838_s15  }
 0x166   : > { %s411_s2 = scalar_lea.sflag [#allocation6], %s410_s13 }
 0x167   : > { %p596_p11 = pnand %p607_p10, %p939_p8 }
 0x169   : > { %p597_p12 = pneg %p596_p11 }
 0x16b   : > { %833 = dma.done.wait (%p597_p12), %s411_s2, 128  }
 0x16c   : > { %835 = vsyncadd (%p597_p12), %s411_s2, 4294967168  ;;  %s20_s20 = sadd.s32 1, %s858_s20   ;;  %s1061_s25 = sld [smem:[#allocation17_spill]] }
 0x16d   : > { %p17_p13 = scmp.ge.s32.totalorder %s20_s20, 7   ;;  %s1062_s15 = smov %s842_s16 }
 0x16e   : > { %s1063_s16 = smov %s846_s17  ;;  %s1064_s17 = smov %s945_s28 }
 0x16f   : > { %s1065_s18 = smov %s854_s19  ;;  %19 = sbr.rel (!%p17_p13) target bundleno = 9 (0x9), region = 91 }
 0x172   : > { %s1066_s19 = smov %s1061_s25 }
 0x174   :  { %417 = vsyncpa [#allocation5], 1 }
 0x175   :  { %419 = vsyncpa [#allocation5 + $0x1], 1 }
 0x176   :  { %420 = vsyncpa [#allocation10], 1 }
 0x177   :  { %421 = vsyncpa [#allocation6], 1 }
 0x178   :  { %423 = vsyncpa [#allocation6 + $0x1], 1 }
 0x179   :  { %424 = vsyncpa [#allocation7], 1 }
 0x17a   :  { %426 = vsyncpa [#allocation7 + $0x1], 1 }

</bundles_post_ra>
